<compile_context>
chip_gen: v6e
topology: v6e:2x2x1
jax: 0.10.0
libtpu: 0.0.40
codegen_flags: <defaults>
</compile_context>

<pallas_src>
import functools

import jax
import jax.numpy as jnp
import numpy as np
from jax.experimental import pallas as pl
from jax.experimental.pallas import tpu as pltpu


def _translate_kernel(obs_z_ref, scaled_trans_ref, coord_ref, out_ref, *, num_planes):
    # coord_ref / out_ref: (3, R, 128) float32 VMEM blocks in SoA layout:
    #   index 0 = x, 1 = y, 2 = z; each (R, 128) slab is sublane/lane dense.
    # obs_z_ref: (D,) float32 SMEM; scaled_trans_ref: (D, 2) float32 SMEM
    # (translation * resolution, precomputed in the wrapper).
    z = coord_ref[2]                                        # (R, 128)
    shift_x = jnp.zeros_like(z)
    shift_y = jnp.zeros_like(z)
    # D is tiny and static -> unrolled; add-form so duplicate planes stack,
    # exactly like the reference loop.
    for d in range(num_planes):
        m = z == obs_z_ref[d]                               # (R, 128) bool
        shift_x = shift_x + jnp.where(m, scaled_trans_ref[d, 0], 0.0)
        shift_y = shift_y + jnp.where(m, scaled_trans_ref[d, 1], 0.0)
    out_ref[0] = coord_ref[0] + shift_x
    out_ref[1] = coord_ref[1] + shift_y
    out_ref[2] = z


_R_MAX = 1024   # 1024 sublane-rows * 128 lanes = 131072 points per block


def _choose_rows(chunks):
    # chunks = N_pad / 128 (a multiple of 8). Big blocks amortize the ~0.35 us
    # per-grid-step overhead; keep >=2 grid steps once there is enough work so
    # v7x's second TensorCore gets fed via the "parallel" axis (costs at most
    # one extra ~0.35 us step on single-TC v5e/v6e). Bucket to powers of two.
    if chunks <= 0:
        return 8
    target = chunks if chunks <= 16 else -(-chunks // 2)    # cdiv(chunks, 2)
    r = min(_R_MAX, pl.next_power_of_2(max(8, target)))
    return min(r, chunks)


@functools.partial(jax.jit, static_argnames=("num_planes", "rows"))
def _fixed_translation_fwd(coords, observe_z, scaled_trans, *, num_planes, rows):
    n = coords.shape[0]
    n_pad = ((n + 1023) // 1024) * 1024                     # multiple of 8*128
    chunks = n_pad // 128

    # AoS -> sublane-dense SoA; pad + transpose + reshape fuse into one XLA
    # fusion inside this jit (interface is fixed to (N, 3), so this layout
    # change cannot be removed, only fused).
    coords_soa = jnp.transpose(coords)                      # (3, n)
    coords_soa = jnp.pad(coords_soa, ((0, 0), (0, n_pad - n)))
    coords_soa = coords_soa.reshape(3, chunks, 128)

    out_soa = pl.pallas_call(
        functools.partial(_translate_kernel, num_planes=num_planes),
        out_shape=jax.ShapeDtypeStruct((3, chunks, 128), jnp.float32),
        grid=(pl.cdiv(chunks, rows),),                      # partial last block OK
        in_specs=[
            pl.BlockSpec(memory_space=pltpu.MemorySpace.SMEM),  # observe_z
            pl.BlockSpec(memory_space=pltpu.MemorySpace.SMEM),  # translation*res
            pl.BlockSpec((3, rows, 128), lambda i: (0, i, 0)),  # coords SoA
        ],
        out_specs=pl.BlockSpec((3, rows, 128), lambda i: (0, i, 0)),
        compiler_params=pltpu.CompilerParams(
            dimension_semantics=("parallel",),
            vmem_limit_bytes=32 * 1024 * 1024,
            allow_input_fusion=[False, False, True],        # fuse producer of coords
        ),
    )(observe_z, scaled_trans, coords_soa)

    # SoA -> AoS back; reshape + transpose + slice fuse into one pass.
    return jnp.transpose(out_soa.reshape(3, n_pad))[:n]     # (n, 3)


class FixedTranslation:
    """JAX/Pallas port of the PyTorch FixedTranslation module."""

    def __init__(self, translation, base_plane, observe_z, resolution):
        translation_np = np.asarray(translation, np.float32)       # (D, 2)
        observe_z_np = np.asarray(observe_z, np.float32)           # (D,)
        self._num_planes = int(observe_z_np.shape[0])
        self._observe_z = jnp.asarray(observe_z_np)
        self._scaled_translation = jnp.asarray(
            translation_np * np.float32(resolution))               # (D, 2)
        # Second output is a constant of the module -> precompute once on host.
        rows = [i for i in range(self._num_planes) if i != int(base_plane)]
        self._trans_rows = jnp.asarray(translation_np[rows].reshape(-1))

    def __call__(self, observe_coordinates):
        coords = jnp.asarray(observe_coordinates, jnp.float32)     # (N, 3)
        n = int(coords.shape[0])
        chunks = ((n + 1023) // 1024) * 8                          # N_pad / 128
        rows = _choose_rows(chunks)
        out_coords = _fixed_translation_fwd(
            coords, self._observe_z, self._scaled_translation,
            num_planes=self._num_planes, rows=rows,
        )
        return out_coords, self._trans_rows


def _reference(coords, observe_z, translation, resolution, base_plane):
    ref = np.array(coords, dtype=np.float32, copy=True)
    for di in range(len(observe_z)):
        ref[ref[:, 2] == observe_z[di], :2] += translation[di] * resolution
    rows = [i for i in range(len(observe_z)) if i != base_plane]
    return ref, np.asarray(translation, np.float32)[rows].flatten()


if __name__ == "__main__":
    key = jax.random.PRNGKey(0)

    # Deterministic "module parameters" (shapes implied by forward()):
    observe_z = [0.0, 5.0, 10.0]                                    # D = 3 planes
    translation = np.array(
        [[0.5, -0.25], [1.0, 2.0], [-0.75, 0.5]], dtype=np.float32  # (D, 2)
    )
    base_plane = 1
    resolution = 2.0

    module = FixedTranslation(translation, base_plane, observe_z, resolution)

    ok = True
    for N in (300, 2500):   # exercises padding, single-step and 2-step grids
        k_xy, k_z, key = jax.random.split(key, 3)
        xy = jax.random.uniform(k_xy, (N, 2), jnp.float32, minval=-10.0, maxval=10.0)
        z_idx = jax.random.randint(k_z, (N,), 0, len(observe_z))
        z = jnp.asarray(observe_z, jnp.float32)[z_idx]
        coords = jnp.concatenate([xy, z[:, None]], axis=1)          # (N, 3)

        out_coords, trans_rows = module(coords)
        jax.block_until_ready(out_coords)
        jax.block_until_ready(trans_rows)

        ref_coords, ref_rows = _reference(
            np.asarray(coords), observe_z, translation, resolution, base_plane)
        ok &= np.allclose(np.asarray(out_coords), ref_coords, atol=1e-5)
        ok &= np.allclose(np.asarray(trans_rows), ref_rows, atol=1e-6)

    assert ok, "mismatch vs. numpy reference"
    print("KERNEL_OK")
</pallas_src>

<mosaic_0001>
module attributes {stable_mosaic.version = 11 : i64} {
  func.func @_translate_kernel(%arg0: i32, %arg1: memref<3xf32, #tpu.memory_space<smem>>, %arg2: memref<3x2xf32, #tpu.memory_space<smem>>, %arg3: memref<3x8x128xf32, #tpu.memory_space<vmem>>, %arg4: memref<3x8x128xf32, #tpu.memory_space<vmem>>) attributes {dimension_semantics = [#tpu.dimension_semantics<parallel>], iteration_bounds = array<i64: 1>, scalar_prefetch = 0 : i64, scratch_operands = 0 : i64, tpu.core_type = #tpu.core_type<tc>, window_params = [{transform_indices = @transform_0, window_bounds = array<i64: 3>}, {transform_indices = @transform_1, window_bounds = array<i64: 3, 2>}, {transform_indices = @transform_2, window_bounds = array<i64: 3, 8, 128>}, {transform_indices = @transform_3, window_bounds = array<i64: 3, 8, 128>}]} {
    %c2 = arith.constant 2 : index
    %c0 = arith.constant 0 : index
    %c0_0 = arith.constant 0 : index
    %0 = vector.load %arg3[%c2, %c0, %c0_0] : memref<3x8x128xf32, #tpu.memory_space<vmem>>, vector<1x8x128xf32>
    %1 = vector.shape_cast %0 : vector<1x8x128xf32> to vector<8x128xf32>
    %cst = arith.constant 0.000000e+00 : f32
    %2 = vector.broadcast %cst : f32 to vector<8x128xf32>
    %cst_1 = arith.constant 0.000000e+00 : f32
    %3 = vector.broadcast %cst_1 : f32 to vector<8x128xf32>
    %c0_2 = arith.constant 0 : index
    %4 = memref.load %arg1[%c0_2] : memref<3xf32, #tpu.memory_space<smem>>
    %5 = vector.broadcast %4 : f32 to vector<8x128xf32>
    %6 = arith.cmpf oeq, %1, %5 : vector<8x128xf32>
    %c0_3 = arith.constant 0 : index
    %c0_4 = arith.constant 0 : index
    %7 = memref.load %arg2[%c0_3, %c0_4] : memref<3x2xf32, #tpu.memory_space<smem>>
    %cst_5 = arith.constant 0.000000e+00 : f32
    %8 = vector.broadcast %7 : f32 to vector<8x128xf32>
    %9 = vector.broadcast %cst_5 : f32 to vector<8x128xf32>
    %10 = arith.select %6, %8, %9 : vector<8x128xi1>, vector<8x128xf32>
    %11 = arith.addf %2, %10 : vector<8x128xf32>
    %c0_6 = arith.constant 0 : index
    %c1 = arith.constant 1 : index
    %12 = memref.load %arg2[%c0_6, %c1] : memref<3x2xf32, #tpu.memory_space<smem>>
    %cst_7 = arith.constant 0.000000e+00 : f32
    %13 = vector.broadcast %12 : f32 to vector<8x128xf32>
    %14 = vector.broadcast %cst_7 : f32 to vector<8x128xf32>
    %15 = arith.select %6, %13, %14 : vector<8x128xi1>, vector<8x128xf32>
    %16 = arith.addf %3, %15 : vector<8x128xf32>
    %c1_8 = arith.constant 1 : index
    %17 = memref.load %arg1[%c1_8] : memref<3xf32, #tpu.memory_space<smem>>
    %18 = vector.broadcast %17 : f32 to vector<8x128xf32>
    %19 = arith.cmpf oeq, %1, %18 : vector<8x128xf32>
    %c1_9 = arith.constant 1 : index
    %c0_10 = arith.constant 0 : index
    %20 = memref.load %arg2[%c1_9, %c0_10] : memref<3x2xf32, #tpu.memory_space<smem>>
    %cst_11 = arith.constant 0.000000e+00 : f32
    %21 = vector.broadcast %20 : f32 to vector<8x128xf32>
    %22 = vector.broadcast %cst_11 : f32 to vector<8x128xf32>
    %23 = arith.select %19, %21, %22 : vector<8x128xi1>, vector<8x128xf32>
    %24 = arith.addf %11, %23 : vector<8x128xf32>
    %c1_12 = arith.constant 1 : index
    %c1_13 = arith.constant 1 : index
    %25 = memref.load %arg2[%c1_12, %c1_13] : memref<3x2xf32, #tpu.memory_space<smem>>
    %cst_14 = arith.constant 0.000000e+00 : f32
    %26 = vector.broadcast %25 : f32 to vector<8x128xf32>
    %27 = vector.broadcast %cst_14 : f32 to vector<8x128xf32>
    %28 = arith.select %19, %26, %27 : vector<8x128xi1>, vector<8x128xf32>
    %29 = arith.addf %16, %28 : vector<8x128xf32>
    %c2_15 = arith.constant 2 : index
    %30 = memref.load %arg1[%c2_15] : memref<3xf32, #tpu.memory_space<smem>>
    %31 = vector.broadcast %30 : f32 to vector<8x128xf32>
    %32 = arith.cmpf oeq, %1, %31 : vector<8x128xf32>
    %c2_16 = arith.constant 2 : index
    %c0_17 = arith.constant 0 : index
    %33 = memref.load %arg2[%c2_16, %c0_17] : memref<3x2xf32, #tpu.memory_space<smem>>
    %cst_18 = arith.constant 0.000000e+00 : f32
    %34 = vector.broadcast %33 : f32 to vector<8x128xf32>
    %35 = vector.broadcast %cst_18 : f32 to vector<8x128xf32>
    %36 = arith.select %32, %34, %35 : vector<8x128xi1>, vector<8x128xf32>
    %37 = arith.addf %24, %36 : vector<8x128xf32>
    %c2_19 = arith.constant 2 : index
    %c1_20 = arith.constant 1 : index
    %38 = memref.load %arg2[%c2_19, %c1_20] : memref<3x2xf32, #tpu.memory_space<smem>>
    %cst_21 = arith.constant 0.000000e+00 : f32
    %39 = vector.broadcast %38 : f32 to vector<8x128xf32>
    %40 = vector.broadcast %cst_21 : f32 to vector<8x128xf32>
    %41 = arith.select %32, %39, %40 : vector<8x128xi1>, vector<8x128xf32>
    %42 = arith.addf %29, %41 : vector<8x128xf32>
    %c0_22 = arith.constant 0 : index
    %c0_23 = arith.constant 0 : index
    %c0_24 = arith.constant 0 : index
    %43 = vector.load %arg3[%c0_22, %c0_23, %c0_24] : memref<3x8x128xf32, #tpu.memory_space<vmem>>, vector<1x8x128xf32>
    %44 = vector.shape_cast %43 : vector<1x8x128xf32> to vector<8x128xf32>
    %45 = arith.addf %44, %37 : vector<8x128xf32>
    %c0_25 = arith.constant 0 : index
    %c0_26 = arith.constant 0 : index
    %c0_27 = arith.constant 0 : index
    %46 = vector.load %arg4[%c0_25, %c0_26, %c0_27] : memref<3x8x128xf32, #tpu.memory_space<vmem>>, vector<1x8x128xf32>
    %47 = vector.shape_cast %46 : vector<1x8x128xf32> to vector<8x128xf32>
    %48 = vector.shape_cast %45 : vector<8x128xf32> to vector<1x8x128xf32>
    tpu.vector_store %arg4[%c0_25, %c0_26, %c0_27], %48 {strides = array<i32>} : memref<3x8x128xf32, #tpu.memory_space<vmem>>, vector<1x8x128xf32>,
    %c1_28 = arith.constant 1 : index
    %c0_29 = arith.constant 0 : index
    %c0_30 = arith.constant 0 : index
    %49 = vector.load %arg3[%c1_28, %c0_29, %c0_30] : memref<3x8x128xf32, #tpu.memory_space<vmem>>, vector<1x8x128xf32>
    %50 = vector.shape_cast %49 : vector<1x8x128xf32> to vector<8x128xf32>
    %51 = arith.addf %50, %42 : vector<8x128xf32>
    %c1_31 = arith.constant 1 : index
    %c0_32 = arith.constant 0 : index
    %c0_33 = arith.constant 0 : index
    %52 = vector.load %arg4[%c1_31, %c0_32, %c0_33] : memref<3x8x128xf32, #tpu.memory_space<vmem>>, vector<1x8x128xf32>
    %53 = vector.shape_cast %52 : vector<1x8x128xf32> to vector<8x128xf32>
    %54 = vector.shape_cast %51 : vector<8x128xf32> to vector<1x8x128xf32>
    tpu.vector_store %arg4[%c1_31, %c0_32, %c0_33], %54 {strides = array<i32>} : memref<3x8x128xf32, #tpu.memory_space<vmem>>, vector<1x8x128xf32>,
    %c2_34 = arith.constant 2 : index
    %c0_35 = arith.constant 0 : index
    %c0_36 = arith.constant 0 : index
    %55 = vector.load %arg4[%c2_34, %c0_35, %c0_36] : memref<3x8x128xf32, #tpu.memory_space<vmem>>, vector<1x8x128xf32>
    %56 = vector.shape_cast %55 : vector<1x8x128xf32> to vector<8x128xf32>
    %57 = vector.shape_cast %1 : vector<8x128xf32> to vector<1x8x128xf32>
    tpu.vector_store %arg4[%c2_34, %c0_35, %c0_36], %57 {strides = array<i32>} : memref<3x8x128xf32, #tpu.memory_space<vmem>>, vector<1x8x128xf32>,
    return
  }
  func.func @transform_0(%arg0: i32) -> i32 {
    %c0_i32 = arith.constant 0 : i32
    %c0_i32_0 = arith.constant 0 : i32
    return %c0_i32 : i32
  }
  func.func @transform_1(%arg0: i32) -> (i32, i32) {
    %c0_i32 = arith.constant 0 : i32
    %c0_i32_0 = arith.constant 0 : i32
    %c0_i32_1 = arith.constant 0 : i32
    return %c0_i32, %c0_i32_0 : i32, i32
  }
  func.func @transform_2(%arg0: i32) -> (i32, i32, i32) {
    %c0_i32 = arith.constant 0 : i32
    %c0_i32_0 = arith.constant 0 : i32
    %c0_i32_1 = arith.constant 0 : i32
    return %c0_i32, %arg0, %c0_i32_0 : i32, i32, i32
  }
  func.func @transform_3(%arg0: i32) -> (i32, i32, i32) {
    %c0_i32 = arith.constant 0 : i32
    %c0_i32_0 = arith.constant 0 : i32
    %c0_i32_1 = arith.constant 0 : i32
    return %c0_i32, %arg0, %c0_i32_0 : i32, i32, i32
  }
}

</mosaic_0001>

<bundles_post_ra>
// kernel: _fixed_translation_fwd.2
= control target key start
LH: loop header
LB: loop body
LE: loop exit
PB: predicated region body
PF: predicated region fallthrough
CT: control target
= control target key end

     0   :  { %8 = vsyncpa [#allocation3], 0  ;;  %s193_s0 = inlined_call_operand.vmem [shape: f32[3], index: 0, kind: input, shape index: {}]   ;;  %s194_s1 = inlined_call_operand.vmem [shape: f32[3,2], index: 1, kind: input, shape index: {}]   ;;  %s195_s2 = inlined_call_operand.vmem [shape: f32[1,3,8,128], index: 2, kind: input, shape index: {}]   ;;  %s196_s3 = inlined_call_operand.vmem [shape: f32[3,8,128], index: 3, kind: output, shape index: {}]  }
   0x1   :  { %s16_s14 = sshll.u32 %s193_s0, 4  ;;  %s17_s14 = int_to_ptr.vmem [resolvable:$true] %s16_s14 }
   0x2   :  { %9 = vsyncpa [#allocation5], 0  ;;  %s26_s17 = sshll.u32 %s194_s1, 4  ;;  %s119_s18 = scalar_lea.vmem %s17_s14, 16  ;;  %s27_s17 = int_to_ptr.vmem [resolvable:$true] %s26_s17 }
   0x3   :  { %p120_p0 = scmp.ne.s32.totalorder %s17_s14, %s119_s18  ;;  %p124_p1 = scmp.lt.s32.totalorder %s17_s14, %s17_s14 }
   0x4   :  { %p125_p2 = scmp.lt.s32.totalorder %s119_s18, %s119_s18 }
   0x6   :  { %p126_p3 = por %p125_p2, %p124_p1 }
   0x8   :  { %p127_p4 = pnand %p126_p3, %p120_p0 }
   0xa   :  { %130 = shalt.err (!%p127_p4)
}
   0xb   :  { %s147_s19 = smov [#allocation2]   ;;  %s131_s20 = scalar_lea.vmem %s27_s17, 64 }
   0xc   :  { %19 = dma.vmem_to_smem %s17_s14, 16, %s147_s19, [#allocation3]  }
   0xd   :  { %p132_p5 = scmp.ne.s32.totalorder %s27_s17, %s131_s20  ;;  %p136_p6 = scmp.lt.s32.totalorder %s27_s17, %s27_s17 }
   0xe   :  { %p137_p7 = scmp.lt.s32.totalorder %s131_s20, %s131_s20 }
  0x10   :  { %p138_p8 = por %p137_p7, %p136_p6 }
  0x12   :  { %p139_p9 = pnand %p138_p8, %p132_p5 }
  0x14   :  { %142 = shalt.err (!%p139_p9)
}
  0x15   :  { %s148_s0 = smov [#allocation4]  }
  0x16   :  { %29 = dma.vmem_to_smem %s27_s17, 64, %s148_s0, [#allocation5]  }
  0x17   :  { %143 = dma.done.wait [#allocation3], 16  }
  0x18   :  { %144 = vsyncadd [#allocation3], 4294967280 }
  0x19   :  { %145 = dma.done.wait [#allocation5], 64  }
  0x1a   :  { %146 = vsyncadd [#allocation5], 4294967232 }
  0x1b   :  { %38 = sfence }
  0x1c   :  { %v107_v0 = vld [vmem:[%s195_s2 + $0x10] sm:$0xff]  ;;  %s57_s22 = sld [smem:[#allocation2]]  ;;  %v39_v15 = vld [vmem:[%s195_s2] sm:$0xff]  ;;  %v106_v18 = vld [vmem:[%s195_s2 + $0x8] sm:$0xff] }
  0x1d   :  { %s60_s23 = sld [smem:[#allocation4]]  ;;  %116 = vst [vmem:[%s196_s3 + $0x10] sm:$0xff] %v107_v0 }
  0x1e   :  { %s108_s26 = sld [smem:[#allocation4 + $0x1]] }
  0x1f   :  { %s109_s27 = sld [smem:[#allocation2 + $0x1]] }
  0x20   :  { %s110_s28 = sld [smem:[#allocation4 + $0x80]] }
  0x21   :  { %s111_s29 = sld [smem:[#allocation4 + $0x81]] }
  0x22   :  { %v58_v1 = vstv %s57_s22  ;;  %s112_s30 = sld [smem:[#allocation2 + $0x2]] }
  0x23   :  { %vm59_vm0 = vcmp.eq.f32.partialorder %v107_v0, %v58_v1  ;;  %v61_v2 = vstv %s60_s23  ;;  %s113_s4 = sld [smem:[#allocation4 + $0x100]] }
  0x24   :  { %v65_v3 = vstv %s108_s26  ;;  %s114_s5 = sld [smem:[#allocation4 + $0x101]]  ;;  %v62_v4 = vsel %vm59_vm0, %v61_v2, 0.0 }
  0x25   :  { %v69_v5 = vstv %s109_s27  ;;  %v66_v6 = vsel %vm59_vm0, %v65_v3, 0.0 }
  0x26   :  { %vm70_vm1 = vcmp.eq.f32.partialorder %v107_v0, %v69_v5  ;;  %v72_v7 = vstv %s110_s28 }
  0x27   :  { %v73_v8 = vsel %vm70_vm1, %v72_v7, 0.0  ;;  %v76_v9 = vstv %s111_s29 }
  0x28   :  { %v74_v10 = vadd.f32 %v73_v8, %v62_v4  ;;  %v77_v11 = vsel %vm70_vm1, %v76_v9, 0.0  ;;  %v80_v12 = vstv %s112_s30 }
  0x29   :  { %v78_v13 = vadd.f32 %v77_v11, %v66_v6  ;;  %vm81_vm2 = vcmp.eq.f32.partialorder %v107_v0, %v80_v12  ;;  %v83_v14 = vstv %s113_s4 }
  0x2a   :  { %v84_v16 = vsel %vm81_vm2, %v83_v14, 0.0  ;;  %v87_v17 = vstv %s114_s5 }
  0x2b   :  { %v85_v19 = vadd.f32 %v84_v16, %v74_v10  ;;  %v88_v20 = vsel %vm81_vm2, %v87_v17, 0.0 }
  0x2c   :  { %v89_v21 = vadd.f32 %v88_v20, %v78_v13 }
  0x2d   :  { %v91_v22 = vadd.f32 %v85_v19, %v39_v15 }
  0x2e   :  { %v95_v23 = vadd.f32 %v106_v18, %v89_v21 }
  0x2f   :  { %92 = vst [vmem:[%s196_s3] sm:$0xff] %v91_v22 }
  0x30   :  { %115 = vst [vmem:[%s196_s3 + $0x8] sm:$0xff] %v95_v23 }
  0x31   :  { %104 = vsyncpa [#allocation3], 1 }
  0x32   :  { %105 = vsyncpa [#allocation5], 1 }

</bundles_post_ra>
